<compile_context>
chip_gen: v7x
topology: tpu7x:2x2x1
jax: 0.10.0
libtpu: 0.0.40
codegen_flags: <defaults>
</compile_context>

<pallas_src>
import functools

import jax
import jax.numpy as jnp
from jax.experimental import pallas as pl
from jax.experimental.pallas import tpu as pltpu


def _dropout_kernel(seed_ref, x_ref, o_ref, *, threshold: int, inv_keep: float):
    tr, lanes = x_ref.shape
    blk = pl.program_id(0)

    # Globally unique per-element counter (block offset folded in).
    row = jax.lax.broadcasted_iota(jnp.int32, (tr, lanes), 0)
    col = jax.lax.broadcasted_iota(jnp.int32, (tr, lanes), 1)
    ctr = ((blk * tr + row) * lanes + col).astype(jnp.uint32)

    # Keyed counter-based PRNG: lowbias32 integer mix (wrapping uint32 math).
    key = seed_ref[0].astype(jnp.uint32) * jnp.uint32(0x9E3779B9)
    v = ctr + key
    v = v ^ (v >> jnp.uint32(16))
    v = v * jnp.uint32(0x7FEB352D)
    v = v ^ (v >> jnp.uint32(15))
    v = v * jnp.uint32(0x846CA68B)
    v = v ^ (v >> jnp.uint32(16))

    # Integer threshold compare -> keep mask; scale in f32, cast once at store.
    keep = v < jnp.uint32(threshold)
    xv = x_ref[...].astype(jnp.float32)
    o_ref[...] = jnp.where(keep, xv * jnp.float32(inv_keep),
                           jnp.float32(0.0)).astype(o_ref.dtype)


def _round_up(n: int, m: int) -> int:
    return ((n + m - 1) // m) * m


def my_dropout(x: jax.Array, p: float = 0.5, *, training: bool = True,
               seed: int = 0) -> jax.Array:
    """Pallas-TPU equivalent of MyDropout.forward."""
    if p < 0.0 or p > 1.0:
        raise ValueError(
            "dropout probability has to be between 0 and 1, but got {}".format(p))
    if not training or p == 0.0:
        return x
    if p == 1.0:
        return jnp.zeros_like(x)

    keep_prob = 1.0 - p
    inv_keep = 1.0 / keep_prob
    # Integer threshold on raw 32-bit hash output: P(bits < threshold) = keep_prob.
    threshold = min(int(round(keep_prob * (2 ** 32))), 2 ** 32 - 1)

    orig_shape = x.shape
    flat = x.reshape(-1)
    total = flat.size

    LANES = 512      # wide lane-dense slab (multiple of 128 -> unmasked stores)
    TR_MAX = 1024    # 1024 x 512 x 4B = 2 MiB f32 block; 4 live buffers ~ 8 MiB

    rows = pl.cdiv(total, LANES)
    rows_p = _round_up(rows, 8)
    tr = rows_p if rows_p <= TR_MAX else TR_MAX
    rows_p = _round_up(rows_p, tr)
    padded = rows_p * LANES
    if padded != total:
        flat = jnp.pad(flat, (0, padded - total))
    x2d = flat.reshape(rows_p, LANES)

    seed_arr = jnp.asarray([seed], dtype=jnp.int32)
    kernel = functools.partial(_dropout_kernel, threshold=threshold,
                               inv_keep=inv_keep)

    out2d = pl.pallas_call(
        kernel,
        out_shape=jax.ShapeDtypeStruct(x2d.shape, x2d.dtype),
        grid_spec=pltpu.PrefetchScalarGridSpec(
            num_scalar_prefetch=1,
            grid=(rows_p // tr,),
            in_specs=[pl.BlockSpec((tr, LANES), lambda i, seed_ref: (i, 0))],
            out_specs=pl.BlockSpec((tr, LANES), lambda i, seed_ref: (i, 0)),
        ),
        compiler_params=pltpu.CompilerParams(
            dimension_semantics=("parallel",),
            vmem_limit_bytes=64 << 20),
    )(seed_arr, x2d)

    out = out2d.reshape(-1)
    if padded != total:
        out = out[:total]
    return out.reshape(orig_shape)


if __name__ == "__main__":
    key = jax.random.PRNGKey(0)
    # Small NCHW input consistent with use inside a MNIST-style conv net.
    x = jax.random.normal(key, (2, 4, 16, 16), dtype=jnp.float32)

    p = 0.5
    y_train = my_dropout(x, p=p, training=True, seed=0)
    y_eval = my_dropout(x, p=p, training=False)
    jax.block_until_ready(y_train)
    jax.block_until_ready(y_eval)

    # Sanity checks: kept elements are scaled by 1/(1-p), dropped are zero,
    # eval mode is identity, and roughly keep_prob of elements survive.
    scale = 1.0 / (1.0 - p)
    mask = y_train != 0.0
    assert jnp.allclose(jnp.where(mask, y_train, 0.0),
                        jnp.where(mask, x * scale, 0.0), atol=1e-5, rtol=1e-5)
    assert jnp.allclose(y_eval, x)
    kept_frac = float(jnp.mean(mask.astype(jnp.float32)))
    assert 0.3 < kept_frac < 0.7, kept_frac

    print("KERNEL_OK")
</pallas_src>

<mosaic_0001>
module attributes {stable_mosaic.version = 11 : i64} {
  func.func @_dropout_kernel(%arg0: i32, %arg1: memref<1xi32, #tpu.memory_space<smem>>, %arg2: memref<8x512xf32, #tpu.memory_space<vmem>>, %arg3: memref<8x512xf32, #tpu.memory_space<vmem>>) attributes {dimension_semantics = [#tpu.dimension_semantics<parallel>], iteration_bounds = array<i64: 1>, scalar_prefetch = 1 : i64, scratch_operands = 0 : i64, tpu.core_type = #tpu.core_type<tc>, window_params = [{transform_indices = @transform_0, window_bounds = array<i64: 8, 512>}, {transform_indices = @transform_1, window_bounds = array<i64: 8, 512>}]} {
    %0 = tpu.iota {dimensions = array<i32: 0>} : vector<8x512xi32>
    %1 = tpu.iota {dimensions = array<i32: 1>} : vector<8x512xi32>
    %c8_i32 = arith.constant 8 : i32
    %2 = arith.muli %arg0, %c8_i32 : i32
    %3 = vector.broadcast %2 : i32 to vector<8x512xi32>
    %4 = arith.addi %3, %0 : vector<8x512xi32>
    %c512_i32 = arith.constant 512 : i32
    %5 = vector.broadcast %c512_i32 : i32 to vector<8x512xi32>
    %6 = arith.muli %4, %5 : vector<8x512xi32>
    %7 = arith.addi %6, %1 : vector<8x512xi32>
    %c0 = arith.constant 0 : index
    %8 = memref.load %arg1[%c0] : memref<1xi32, #tpu.memory_space<smem>>
    %c-1640531527_i32 = arith.constant -1640531527 : i32
    %9 = arith.muli %8, %c-1640531527_i32 : i32
    %10 = vector.broadcast %9 : i32 to vector<8x512xi32>
    %11 = arith.addi %7, %10 : vector<8x512xi32>
    %c16_i32 = arith.constant 16 : i32
    %12 = vector.broadcast %c16_i32 : i32 to vector<8x512xi32>
    %13 = arith.shrui %11, %12 : vector<8x512xi32>
    %14 = arith.xori %11, %13 : vector<8x512xi32>
    %c2146121005_i32 = arith.constant 2146121005 : i32
    %15 = vector.broadcast %c2146121005_i32 : i32 to vector<8x512xi32>
    %16 = arith.muli %14, %15 : vector<8x512xi32>
    %c15_i32 = arith.constant 15 : i32
    %17 = vector.broadcast %c15_i32 : i32 to vector<8x512xi32>
    %18 = arith.shrui %16, %17 : vector<8x512xi32>
    %19 = arith.xori %16, %18 : vector<8x512xi32>
    %c-2073254261_i32 = arith.constant -2073254261 : i32
    %20 = vector.broadcast %c-2073254261_i32 : i32 to vector<8x512xi32>
    %21 = arith.muli %19, %20 : vector<8x512xi32>
    %c16_i32_0 = arith.constant 16 : i32
    %22 = vector.broadcast %c16_i32_0 : i32 to vector<8x512xi32>
    %23 = arith.shrui %21, %22 : vector<8x512xi32>
    %24 = arith.xori %21, %23 : vector<8x512xi32>
    %c-2147483648_i32 = arith.constant -2147483648 : i32
    %25 = vector.broadcast %c-2147483648_i32 : i32 to vector<8x512xi32>
    %26 = arith.cmpi ult, %24, %25 : vector<8x512xi32>
    %c0_1 = arith.constant 0 : index
    %c0_2 = arith.constant 0 : index
    %27 = vector.load %arg2[%c0_1, %c0_2] : memref<8x512xf32, #tpu.memory_space<vmem>>, vector<8x512xf32>
    %cst = arith.constant 2.000000e+00 : f32
    %28 = vector.broadcast %cst : f32 to vector<8x512xf32>
    %29 = arith.mulf %27, %28 : vector<8x512xf32>
    %cst_3 = arith.constant 0.000000e+00 : f32
    %30 = vector.broadcast %cst_3 : f32 to vector<8x512xf32>
    %31 = arith.select %26, %29, %30 : vector<8x512xi1>, vector<8x512xf32>
    %c0_4 = arith.constant 0 : index
    %c0_5 = arith.constant 0 : index
    %32 = vector.load %arg3[%c0_4, %c0_5] : memref<8x512xf32, #tpu.memory_space<vmem>>, vector<8x512xf32>
    tpu.vector_store %arg3[%c0_4, %c0_5], %31 {strides = array<i32>} : memref<8x512xf32, #tpu.memory_space<vmem>>, vector<8x512xf32>,
    return
  }
  func.func @transform_0(%arg0: i32, %arg1: memref<1xi32, #tpu.memory_space<smem>>) -> (i32, i32) {
    %c0_i32 = arith.constant 0 : i32
    %c0_i32_0 = arith.constant 0 : i32
    return %arg0, %c0_i32 : i32, i32
  }
  func.func @transform_1(%arg0: i32, %arg1: memref<1xi32, #tpu.memory_space<smem>>) -> (i32, i32) {
    %c0_i32 = arith.constant 0 : i32
    %c0_i32_0 = arith.constant 0 : i32
    return %arg0, %c0_i32 : i32, i32
  }
}

</mosaic_0001>

<bundles_post_ra>
// kernel: tpu_custom_call.1
= control target key start
LH: loop header
LB: loop body
LE: loop exit
PB: predicated region body
PF: predicated region fallthrough
CT: control target
= control target key end

     0   :  { %8 = vsyncpa [#allocation5], 0  ;;  %s206_s0 = inlined_call_operand.<no memory space> [shape: s32[1], index: 0, kind: input, shape index: {}]   ;;  %s207_s1 = inlined_call_operand.hbm [shape: f32[8,512], index: 1, kind: input, shape index: {}]   ;;  %s208_s2 = inlined_call_operand.hbm [shape: f32[8,512], index: 2, kind: output, shape index: {}]  }
   0x1   :  { %9 = vsyncpa [#allocation6], 0  ;;  %s162_s9 = smov [#allocation4]   ;;  %s114_s13 = scalar_lea.hbm %s207_s1, 512 }
   0x2   :  { %s16_s10 = sshll.u32 %s162_s9, 4  ;;  %p115_p0 = scmp.ne.s32.totalorder %s207_s1, %s114_s13  ;;  %s17_s10 = int_to_ptr.vmem [resolvable:$true] %s16_s10 }
   0x3   :  { %p118_p1 = scmp.lt.u32.totalorder %s114_s13, %s207_s1 }
   0x5   :  { %p120_p2 = pnand %p118_p1, %p115_p0 }
   0x7   :  { %123 = shalt.err (!%p120_p2)
}
   0x8   :  { %s124_s18 = scalar_lea.vmem %s17_s10, 512  ;;  %p129_p4 = scmp.lt.s32.totalorder %s17_s10, %s17_s10 }
   0x9   :  { %p125_p3 = scmp.ne.s32.totalorder %s17_s10, %s124_s18  ;;  %p130_p5 = scmp.lt.s32.totalorder %s124_s18, %s124_s18 }
   0xb   :  { %p131_p6 = por %p130_p5, %p129_p4 }
   0xd   :  { %p132_p7 = pnand %p131_p6, %p125_p3 }
   0xf   :  { %135 = shalt.err (!%p132_p7)
}
  0x10   :  { %19 = dma.hbm_to_vmem [thread:$0]  %s207_s1, 512, %s17_s10, [#allocation5]  }
  0x11   :  { %158 = dma.done.wait [#allocation5], 512  }
  0x12   :  { %159 = vsyncadd [#allocation5], 4294966784  ;;  %v23_v0 = vlaneseq  ;;  %s39_s23 = smul.u32 2654435769, %s206_s0  ;;  %v81_v37 = vld [vmem:[#allocation4] sm:$0xff]  ;;  %v82_v39 = vld [vmem:[#allocation4 + $0x8] sm:$0xff] }
  0x13   :  { %v83_v41 = vld [vmem:[#allocation4 + $0x10] sm:$0xff]  ;;  %v84_v43 = vld [vmem:[#allocation4 + $0x18] sm:$0xff]  ;;  %v85_v46 = vmul.f32 2.0, %v81_v37  ;;  %v86_v47 = vmul.f32 2.0, %v82_v39  ;;  %s163_s0 = smov [#allocation7]  }
  0x14   :  { %v24_v1 = vshrl.u32 %v23_v0, 7  ;;  %v26_v2 = vand.u32 127, %v23_v0  ;;  %v40_v7 = vstv %s39_s23  ;;  %v87_v52 = vmul.f32 2.0, %v83_v41  ;;  %s103_s1 = sshll.u32 %s163_s0, 4  ;;  %s104_s1 = int_to_ptr.vmem [resolvable:$true] %s103_s1 }
  0x15   :  { %v88_v53 = vmul.f32 2.0, %v84_v43  ;;  %s136_s24 = scalar_lea.vmem %s104_s1, 512  ;;  %p141_p9 = scmp.lt.s32.totalorder %s104_s1, %s104_s1 }
  0x16   :  { %v33_v3 = vmul.u32 512, %v24_v1  ;;  %v27_v4 = vadd.s32 128, %v26_v2  ;;  %v28_v5 = vadd.s32 256, %v26_v2  ;;  %v29_v6 = vadd.s32 384, %v26_v2  ;;  %p137_p8 = scmp.ne.s32.totalorder %s104_s1, %s136_s24  ;;  %p142_p10 = scmp.lt.s32.totalorder %s136_s24, %s136_s24 }
  0x18   :  { %v34_v8 = vadd.s32 %v33_v3, %v26_v2  ;;  %v35_v9 = vadd.s32 %v33_v3, %v27_v4  ;;  %v36_v10 = vadd.s32 %v33_v3, %v28_v5  ;;  %v37_v11 = vadd.s32 %v33_v3, %v29_v6  ;;  %p143_p11 = por %p142_p10, %p141_p9 }
  0x1a   :  { %v41_v12 = vadd.s32 %v40_v7, %v34_v8  ;;  %v42_v13 = vadd.s32 %v40_v7, %v35_v9  ;;  %v43_v14 = vadd.s32 %v40_v7, %v36_v10  ;;  %v44_v15 = vadd.s32 %v40_v7, %v37_v11  ;;  %p144_p12 = pnand %p143_p11, %p137_p8 }
  0x1c   :  { %v45_v16 = vshrl.u32 %v41_v12, 16  ;;  %v46_v17 = vshrl.u32 %v42_v13, 16  ;;  %v47_v18 = vshrl.u32 %v43_v14, 16  ;;  %v48_v19 = vshrl.u32 %v44_v15, 16 }
  0x1e   :  { %v49_v20 = vxor.u32 %v45_v16, %v41_v12  ;;  %v50_v21 = vxor.u32 %v46_v17, %v42_v13  ;;  %v51_v22 = vxor.u32 %v47_v18, %v43_v14  ;;  %v52_v23 = vxor.u32 %v48_v19, %v44_v15 }
  0x20   :  { %v53_v24 = vmul.u32 2146121005, %v49_v20  ;;  %v54_v25 = vmul.u32 2146121005, %v50_v21 }
  0x21   :  { %v55_v26 = vmul.u32 2146121005, %v51_v22  ;;  %v56_v27 = vmul.u32 2146121005, %v52_v23 }
  0x22   :  { %v57_v28 = vshrl.u32 %v53_v24, 15  ;;  %v58_v29 = vshrl.u32 %v54_v25, 15 }
  0x23   :  { %v59_v30 = vshrl.u32 %v55_v26, 15  ;;  %v60_v31 = vshrl.u32 %v56_v27, 15 }
  0x24   :  { %v61_v32 = vxor.u32 %v57_v28, %v53_v24  ;;  %v62_v33 = vxor.u32 %v58_v29, %v54_v25 }
  0x25   :  { %v63_v34 = vxor.u32 %v59_v30, %v55_v26  ;;  %v64_v35 = vxor.u32 %v60_v31, %v56_v27 }
  0x26   :  { %v65_v36 = vmul.u32 2221713035, %v61_v32  ;;  %v66_v38 = vmul.u32 2221713035, %v62_v33 }
  0x27   :  { %v67_v40 = vmul.u32 2221713035, %v63_v34  ;;  %v68_v42 = vmul.u32 2221713035, %v64_v35 }
  0x28   :  { %v69_v44 = vshrl.u32 %v65_v36, 16  ;;  %v70_v45 = vshrl.u32 %v66_v38, 16 }
  0x29   :  { %v71_v48 = vshrl.u32 %v67_v40, 16  ;;  %v72_v49 = vshrl.u32 %v68_v42, 16 }
  0x2a   :  { %v73_v50 = vxor.u32 %v69_v44, %v65_v36  ;;  %v74_v51 = vxor.u32 %v70_v45, %v66_v38 }
  0x2b   :  { %v75_v54 = vxor.u32 %v71_v48, %v67_v40  ;;  %v76_v55 = vxor.u32 %v72_v49, %v68_v42 }
  0x2c   :  { %vm77_vm0 = vcmp.lt.u32.totalorder %v73_v50, 2147483648  ;;  %vm78_vm1 = vcmp.lt.u32.totalorder %v74_v51, 2147483648 }
  0x2d   :  { %v89_v56 = vsel %vm77_vm0, %v85_v46, 0.0  ;;  %v90_v57 = vsel %vm78_vm1, %v86_v47, 0.0  ;;  %vm79_vm2 = vcmp.lt.u32.totalorder %v75_v54, 2147483648  ;;  %vm80_vm3 = vcmp.lt.u32.totalorder %v76_v55, 2147483648 }
  0x2e   :  { %93 = vst [vmem:[#allocation7] sm:$0xff] %v89_v56  ;;  %94 = vst [vmem:[#allocation7 + $0x8] sm:$0xff] %v90_v57  ;;  %v91_v58 = vsel %vm79_vm2, %v87_v52, 0.0  ;;  %v92_v59 = vsel %vm80_vm3, %v88_v53, 0.0 }
  0x2f   :  { %95 = vst [vmem:[#allocation7 + $0x10] sm:$0xff] %v91_v58  ;;  %96 = vst [vmem:[#allocation7 + $0x18] sm:$0xff] %v92_v59 }
  0x30   :  { %147 = shalt.err (!%p144_p12)
}
  0x31   :  { %s148_s27 = scalar_lea.hbm %s208_s2, 512 }
  0x32   :  { %p149_p13 = scmp.ne.s32.totalorder %s208_s2, %s148_s27  ;;  %p152_p0 = scmp.lt.u32.totalorder %s148_s27, %s208_s2 }
  0x34   :  { %p154_p1 = pnand %p152_p0, %p149_p13 }
  0x36   :  { %157 = shalt.err (!%p154_p1)
}
  0x37   :  { %106 = dma.vmem_to_hbm [thread:$0]  %s104_s1, 512, %s208_s2, [#allocation6]  }
  0x38   :  { %160 = dma.done.wait [#allocation6], 512  }
  0x39   :  { %161 = vsyncadd [#allocation6], 4294966784 }
  0x3a   :  { %110 = vsyncpa [#allocation5], 1 }
  0x3b   :  { %111 = vsyncpa [#allocation6], 1 }

</bundles_post_ra>
